<compile_context>
chip_gen: v5e
topology: v5e:2x2
jax: 0.10.0
libtpu: 0.0.40
codegen_flags: <defaults>
</compile_context>

<pallas_src>
import jax
import jax.numpy as jnp
from jax.experimental import pallas as pl
from jax.experimental.pallas import tpu as pltpu


def mlp_kernel(x_ref, w1_ref, b1_ref, w2_ref, b2_ref, o_ref):
    # Per-tile f32 -> bf16 cast (MXU-native; hidden under the x DMA).
    x_bf16 = x_ref[...].astype(jnp.bfloat16)
    # fc1: [tb,512](bf16) @ [512,32](bf16) -> f32 accumulation on the MXU.
    h = jnp.dot(x_bf16, w1_ref[...], preferred_element_type=jnp.float32)
    h = jnp.maximum(h + b1_ref[...], 0.0)            # bias + ReLU (f32, VPU)
    # Dropout(p=0.6): eval-mode semantics (identity).
    # TODO(synk): training-mode dropout (random mask + 1/(1-p) scaling) not emitted; eval semantics used.
    # fc2 (out_features=1): contract (1,32) with (tb,32) over k so the result is already the
    # lane-dense row (1, tb); + bias, sigmoid (EUP), then an unmasked lane-dense store.
    y = jnp.einsum('ok,tk->ot', w2_ref[...], h, preferred_element_type=jnp.float32)
    o_ref[...] = jax.nn.sigmoid(y + b2_ref[...])


def _default_batch_tile():
    """Batch tile that amortizes per-step overhead but fits the default scoped-VMEM limit."""
    try:
        kind = jax.devices()[0].device_kind.lower()
    except Exception:
        kind = ""
    if "v5 lite" in kind or "v5e" in kind or "v5lite" in kind:
        return 2048   # v5e: 16 MiB default scoped VMEM (2 x 4 MiB x buffers + intermediates)
    return 4096       # v6e/v7x: 32 MiB default scoped VMEM (2 x 8 MiB x buffers + intermediates)


def mlp_forward(x, w1, b1, w2, b2, *, tb=None):
    """x: [B,512] f32. w1: [512,32], b1: [1,32], w2: [32,1], b2: [1,1] (f32). Returns [B,1] f32."""
    B, D = x.shape
    assert D == 512
    if tb is None:
        tb = _default_batch_tile()
    # v7x has 2 TensorCores; with a "parallel" batch axis, >=2 balanced tiles keeps both busy.
    if B > 1024 and pl.cdiv(B, tb) < 2:
        tb = ((pl.cdiv(B, 2) + 7) // 8) * 8
    # Clamp to the (sublane-rounded) batch and keep a multiple of 8.
    tb = min(tb, ((B + 7) // 8) * 8)
    tb = max(8, (tb // 8) * 8)
    n_tiles = pl.cdiv(B, tb)
    B_pad = n_tiles * tb
    if B_pad != B:
        # TODO(synk): a masked final tile would avoid this extra HBM pass for ragged batches.
        x = jnp.pad(x, ((0, B_pad - B), (0, 0)))

    w1_bf16 = w1.astype(jnp.bfloat16)                # tiny (64 KiB), one-time cast, VMEM-resident
    b1_f32 = b1.reshape(1, 32).astype(jnp.float32)
    w2_row = w2.reshape(1, 32).astype(jnp.float32)   # row layout for the (1,32)x(tb,32)^T contraction
    b2_f32 = b2.reshape(1, 1).astype(jnp.float32)

    out_rows = pl.pallas_call(
        mlp_kernel,
        out_shape=jax.ShapeDtypeStruct((n_tiles, tb), jnp.float32),   # lane-dense output slab
        grid_spec=pltpu.PrefetchScalarGridSpec(
            num_scalar_prefetch=0,
            grid=(n_tiles,),
            in_specs=[
                pl.BlockSpec((tb, 512), lambda i: (i, 0)),   # f32 x tile streams per step
                pl.BlockSpec((512, 32), lambda i: (0, 0)),   # w1 (bf16) resident
                pl.BlockSpec((1, 32), lambda i: (0, 0)),     # b1 resident
                pl.BlockSpec((1, 32), lambda i: (0, 0)),     # w2 (row) resident
                pl.BlockSpec((1, 1), lambda i: (0, 0)),      # b2 resident
            ],
            out_specs=pl.BlockSpec((1, tb), lambda i: (i, 0)),
        ),
        compiler_params=pltpu.CompilerParams(
            dimension_semantics=("parallel",)),  # data-parallel batch tiles (2 TCs on v7x)
    )(x, w1_bf16, b1_f32, w2_row, b2_f32)
    return out_rows.reshape(B_pad, 1)[:B]


def init_params(key):
    # Mimic PyTorch nn.Linear default init: U(-1/sqrt(fan_in), 1/sqrt(fan_in)).
    k1, k2, k3, k4 = jax.random.split(key, 4)
    bound1 = 1.0 / jnp.sqrt(512.0)
    bound2 = 1.0 / jnp.sqrt(32.0)
    # Stored transposed relative to PyTorch (in, out) so the kernel does x @ W.
    w1 = jax.random.uniform(k1, (512, 32), jnp.float32, -bound1, bound1)
    b1 = jax.random.uniform(k2, (1, 32), jnp.float32, -bound1, bound1)
    w2 = jax.random.uniform(k3, (32, 1), jnp.float32, -bound2, bound2)
    b2 = jax.random.uniform(k4, (1, 1), jnp.float32, -bound2, bound2)
    return w1, b1, w2, b2


if __name__ == "__main__":
    key = jax.random.PRNGKey(0)
    kx, kp = jax.random.split(key)
    B = 8
    x = jax.random.normal(kx, (B, 512), jnp.float32)
    w1, b1, w2, b2 = init_params(kp)

    out = mlp_forward(x, w1, b1, w2, b2)
    out = jax.block_until_ready(out)
    assert out.shape == (B, 1)

    # Reference with the same bf16 fc1-input cast (f32 accumulation), tight tolerance.
    h_ref = jnp.dot(x.astype(jnp.bfloat16), w1.astype(jnp.bfloat16),
                    preferred_element_type=jnp.float32)
    h_relu = jnp.maximum(h_ref + b1, 0.0)
    y_ref = jnp.dot(h_relu, w2, precision=jax.lax.Precision.HIGHEST) + b2
    ref_bf16 = jax.nn.sigmoid(y_ref)
    assert jnp.allclose(out, ref_bf16, atol=2e-3, rtol=2e-3)

    # Loose sanity check against the pure-f32 reference (bf16 fc1-input rounding only).
    ref_f32 = jax.nn.sigmoid(jnp.maximum(x @ w1 + b1, 0.0) @ w2 + b2)
    assert jnp.allclose(out, ref_f32, atol=5e-2, rtol=5e-2)

    print("KERNEL_OK")
</pallas_src>

<mosaic_0001>
module attributes {stable_mosaic.version = 11 : i64} {
  func.func @mlp_kernel(%arg0: i32, %arg1: memref<8x512xf32, #tpu.memory_space<vmem>>, %arg2: memref<512x32xbf16, #tpu.memory_space<vmem>>, %arg3: memref<1x32xf32, #tpu.memory_space<vmem>>, %arg4: memref<1x32xf32, #tpu.memory_space<vmem>>, %arg5: memref<1x1xf32, #tpu.memory_space<vmem>>, %arg6: memref<1x8xf32, #tpu.memory_space<vmem>>) attributes {dimension_semantics = [#tpu.dimension_semantics<parallel>], iteration_bounds = array<i64: 1>, scalar_prefetch = 0 : i64, scratch_operands = 0 : i64, tpu.core_type = #tpu.core_type<tc>, window_params = [{transform_indices = @transform_0, window_bounds = array<i64: 8, 512>}, {pipeline_mode = #tpu.pipeline_mode<synchronous>, transform_indices = @transform_1, window_bounds = array<i64: 512, 32>}, {pipeline_mode = #tpu.pipeline_mode<synchronous>, transform_indices = @transform_2, window_bounds = array<i64: 1, 32>}, {pipeline_mode = #tpu.pipeline_mode<synchronous>, transform_indices = @transform_3, window_bounds = array<i64: 1, 32>}, {pipeline_mode = #tpu.pipeline_mode<synchronous>, transform_indices = @transform_4, window_bounds = array<i64: 1, 1>}, {transform_indices = @transform_5, window_bounds = array<i64: 1, 8>}]} {
    %c0 = arith.constant 0 : index
    %c0_0 = arith.constant 0 : index
    %0 = vector.load %arg1[%c0, %c0_0] : memref<8x512xf32, #tpu.memory_space<vmem>>, vector<8x512xf32>
    %1 = arith.truncf %0 : vector<8x512xf32> to vector<8x512xbf16>
    %c0_1 = arith.constant 0 : index
    %c0_2 = arith.constant 0 : index
    %2 = vector.load %arg2[%c0_1, %c0_2] : memref<512x32xbf16, #tpu.memory_space<vmem>>, vector<512x32xbf16>
    %cst = arith.constant dense<0.000000e+00> : vector<8x32xf32>
    %3 = tpu.matmul %1, %2, %cst {dimension_numbers = #tpu.dot_dimension_numbers<[1], [0], [0], [1], [0, 0, 1, 1], [], []>} : vector<8x512xbf16>, vector<512x32xbf16>, vector<8x32xf32> -> vector<8x32xf32>
    %c0_3 = arith.constant 0 : index
    %c0_4 = arith.constant 0 : index
    %4 = vector.load %arg3[%c0_3, %c0_4] : memref<1x32xf32, #tpu.memory_space<vmem>>, vector<1x32xf32>
    %5 = vector.broadcast %4 : vector<1x32xf32> to vector<8x32xf32>
    %6 = arith.addf %3, %5 : vector<8x32xf32>
    %cst_5 = arith.constant 0.000000e+00 : f32
    %7 = vector.broadcast %cst_5 : f32 to vector<8x32xf32>
    %8 = arith.maximumf %6, %7 : vector<8x32xf32>
    %c0_6 = arith.constant 0 : index
    %c0_7 = arith.constant 0 : index
    %9 = vector.load %arg4[%c0_6, %c0_7] : memref<1x32xf32, #tpu.memory_space<vmem>>, vector<1x32xf32>
    "tpu.trace_start"() <{level = 10 : i32, message = "ok,tk->ot"}> : () -> ()
    %cst_8 = arith.constant dense<0.000000e+00> : vector<1x8xf32>
    %10 = tpu.matmul %9, %8, %cst_8 {dimension_numbers = #tpu.dot_dimension_numbers<[1], [1], [0], [0], [0, 0, 1, 0], [], []>} : vector<1x32xf32>, vector<8x32xf32>, vector<1x8xf32> -> vector<1x8xf32>
    "tpu.trace_stop"() : () -> ()
    %c0_9 = arith.constant 0 : index
    %c0_10 = arith.constant 0 : index
    %11 = vector.load %arg5[%c0_9, %c0_10] : memref<1x1xf32, #tpu.memory_space<vmem>>, vector<1x1xf32>
    %12 = vector.broadcast %11 : vector<1x1xf32> to vector<1x8xf32>
    %13 = arith.addf %10, %12 : vector<1x8xf32>
    %14 = arith.negf %13 : vector<1x8xf32>
    %15 = math.exp %14 : vector<1x8xf32>
    %cst_11 = arith.constant 1.000000e+00 : f32
    %16 = vector.broadcast %cst_11 : f32 to vector<1x8xf32>
    %17 = arith.addf %16, %15 : vector<1x8xf32>
    %18 = arith.divf %16, %17 : vector<1x8xf32>
    %c0_12 = arith.constant 0 : index
    %c0_13 = arith.constant 0 : index
    %19 = vector.load %arg6[%c0_12, %c0_13] : memref<1x8xf32, #tpu.memory_space<vmem>>, vector<1x8xf32>
    tpu.vector_store %arg6[%c0_12, %c0_13], %18 {strides = array<i32>} : memref<1x8xf32, #tpu.memory_space<vmem>>, vector<1x8xf32>,
    return
  }
  func.func @transform_0(%arg0: i32) -> (i32, i32) {
    %c0_i32 = arith.constant 0 : i32
    %c0_i32_0 = arith.constant 0 : i32
    return %arg0, %c0_i32 : i32, i32
  }
  func.func @transform_1(%arg0: i32) -> (i32, i32) {
    %c0_i32 = arith.constant 0 : i32
    %c0_i32_0 = arith.constant 0 : i32
    %c0_i32_1 = arith.constant 0 : i32
    return %c0_i32, %c0_i32_0 : i32, i32
  }
  func.func @transform_2(%arg0: i32) -> (i32, i32) {
    %c0_i32 = arith.constant 0 : i32
    %c0_i32_0 = arith.constant 0 : i32
    %c0_i32_1 = arith.constant 0 : i32
    return %c0_i32, %c0_i32_0 : i32, i32
  }
  func.func @transform_3(%arg0: i32) -> (i32, i32) {
    %c0_i32 = arith.constant 0 : i32
    %c0_i32_0 = arith.constant 0 : i32
    %c0_i32_1 = arith.constant 0 : i32
    return %c0_i32, %c0_i32_0 : i32, i32
  }
  func.func @transform_4(%arg0: i32) -> (i32, i32) {
    %c0_i32 = arith.constant 0 : i32
    %c0_i32_0 = arith.constant 0 : i32
    %c0_i32_1 = arith.constant 0 : i32
    return %c0_i32, %c0_i32_0 : i32, i32
  }
  func.func @transform_5(%arg0: i32) -> (i32, i32) {
    %c0_i32 = arith.constant 0 : i32
    %c0_i32_0 = arith.constant 0 : i32
    return %arg0, %c0_i32 : i32, i32
  }
}

</mosaic_0001>

<bundles_post_ra>
// kernel: tpu_custom_call.1
= control target key start
LH: loop header
LB: loop body
LE: loop exit
PB: predicated region body
PF: predicated region fallthrough
CT: control target
= control target key end

     0   :  { %s765_s0 = inlined_call_operand.vmem [shape: f32[8,512], index: 0, kind: input, shape index: {}]   ;;  %s766_s1 = inlined_call_operand.vmem [shape: bf16[512,32], index: 1, kind: input, shape index: {}]   ;;  %s767_s2 = inlined_call_operand.vmem [shape: f32[1,32], index: 2, kind: input, shape index: {}]   ;;  %s768_s3 = inlined_call_operand.vmem [shape: f32[1,32], index: 3, kind: input, shape index: {}]   ;;  %s769_s4 = inlined_call_operand.<no memory space> [shape: f32[1,1], index: 4, kind: input, shape index: {}]   ;;  %s770_s5 = inlined_call_operand.hbm [shape: f32[1,8], index: 5, kind: output, shape index: {}]  }
   0x1   :  { %v10_v0 = vstv %s769_s4 }
   0x2   :  { %11 = vst [vmem:[#allocation2] sm:$0x1] %v10_v0 }
   0x3   :  { %v554_v1 = vld [vmem:[%s766_s1 + $0x38] sm:$0xff]  ;;  %v553_v5 = vld [vmem:[%s766_s1 + $0x30] sm:$0xff]  ;;  %v552_v9 = vld [vmem:[%s766_s1 + $0x28] sm:$0xff] }
   0x4   :  { %v562_v2 = vld [vmem:[%s766_s1 + $0x78] sm:$0xff]  ;;  %291 = vmatpush.bf16.msra.mxu0 %v554_v1  ;;  %v561_v6 = vld [vmem:[%s766_s1 + $0x70] sm:$0xff]  ;;  %v560_v10 = vld [vmem:[%s766_s1 + $0x68] sm:$0xff] }
   0x5   :  { %v570_v3 = vld [vmem:[%s766_s1 + $0xb8] sm:$0xff]  ;;  %304 = vmatpush.bf16.msra.mxu1 %v562_v2  ;;  %v569_v7 = vld [vmem:[%s766_s1 + $0xb0] sm:$0xff]  ;;  %v568_v11 = vld [vmem:[%s766_s1 + $0xa8] sm:$0xff] }
   0x6   :  { %v578_v4 = vld [vmem:[%s766_s1 + $0xf8] sm:$0xff]  ;;  %317 = vmatpush.bf16.msra.mxu2 %v570_v3  ;;  %v577_v8 = vld [vmem:[%s766_s1 + $0xf0] sm:$0xff]  ;;  %v576_v12 = vld [vmem:[%s766_s1 + $0xe8] sm:$0xff] }
   0x7   :  { %330 = vmatpush.bf16.msra.mxu3 %v578_v4  ;;  %v551_v13 = vld [vmem:[%s766_s1 + $0x20] sm:$0xff] }
   0x8   :  { %292 = vmatpush.bf16.msra.mxu0 %v553_v5  ;;  %v559_v14 = vld [vmem:[%s766_s1 + $0x60] sm:$0xff] }
   0x9   :  { %305 = vmatpush.bf16.msra.mxu1 %v561_v6  ;;  %v567_v15 = vld [vmem:[%s766_s1 + $0xa0] sm:$0xff] }
   0xa   :  { %318 = vmatpush.bf16.msra.mxu2 %v569_v7  ;;  %v575_v16 = vld [vmem:[%s766_s1 + $0xe0] sm:$0xff] }
   0xb   :  { %331 = vmatpush.bf16.msra.mxu3 %v577_v8 }
   0xc   :  { %293 = vmatpush.bf16.msra.mxu0 %v552_v9 }
   0xd   :  { %306 = vmatpush.bf16.msra.mxu1 %v560_v10 }
   0xe   :  { %319 = vmatpush.bf16.msra.mxu2 %v568_v11 }
   0xf   :  { %332 = vmatpush.bf16.msra.mxu3 %v576_v12 }
  0x10   :  { %12 = vsyncpa [#allocation4], 0  ;;  %294 = vmatpush.bf16.msra.mxu0 %v551_v13  ;;  %v550_v17 = vld [vmem:[%s766_s1 + $0x18] sm:$0xff]  ;;  %v549_v21 = vld [vmem:[%s766_s1 + $0x10] sm:$0xff]  ;;  %v613_v42 = vmov 0   ;;  %vm352_vm0 = vcmask 261120  }
  0x11   :  { %307 = vmatpush.bf16.msra.mxu1 %v559_v14  ;;  %v558_v18 = vld [vmem:[%s766_s1 + $0x58] sm:$0xff]  ;;  %v557_v22 = vld [vmem:[%s766_s1 + $0x50] sm:$0xff]  ;;  %v548_v25 = vld [vmem:[%s766_s1 + $0x8] sm:$0xff]  ;;  %581 = vset.pattern.permute.xlu0 %v613_v42  ;;  %s407_s18 = sshll.u32 %s770_s5, 4  ;;  %vm398_vm4 = vcmask 57344   ;;  %s408_s18 = int_to_ptr.hbm [resolvable:$true] %s407_s18 }
  0x12   :  { %320 = vmatpush.bf16.msra.mxu2 %v567_v15  ;;  %v566_v19 = vld [vmem:[%s766_s1 + $0x98] sm:$0xff]  ;;  %v565_v23 = vld [vmem:[%s766_s1 + $0x90] sm:$0xff]  ;;  %v556_v26 = vld [vmem:[%s766_s1 + $0x48] sm:$0xff] }
  0x13   :  { %333 = vmatpush.bf16.msra.mxu3 %v575_v16  ;;  %v574_v20 = vld [vmem:[%s766_s1 + $0xd8] sm:$0xff]  ;;  %v573_v24 = vld [vmem:[%s766_s1 + $0xd0] sm:$0xff]  ;;  %v564_v27 = vld [vmem:[%s766_s1 + $0x88] sm:$0xff] }
  0x14   :  { %295 = vmatpush.bf16.msra.mxu0 %v550_v17  ;;  %v572_v28 = vld [vmem:[%s766_s1 + $0xc8] sm:$0xff]  ;;  %v547_v29 = vld [vmem:[%s766_s1] sm:$0xff]  ;;  %v25_v35 = vld [vmem:[%s765_s0 + $0x10] sm:$0xff] }
  0x15   :  { %308 = vmatpush.bf16.msra.mxu1 %v558_v18  ;;  %v555_v30 = vld [vmem:[%s766_s1 + $0x40] sm:$0xff]  ;;  %v24_v33 = vld [vmem:[%s765_s0 + $0x8] sm:$0xff]  ;;  %v26_v36 = vld [vmem:[%s765_s0 + $0x18] sm:$0xff]  ;;  %v29_v39 = vpack.c.bf16 %v25_v35, %v25_v35 }
  0x16   :  { %321 = vmatpush.bf16.msra.mxu2 %v566_v19  ;;  %v563_v31 = vld [vmem:[%s766_s1 + $0x80] sm:$0xff]  ;;  %v28_v38 = vpack.c.bf16 %v24_v33, %v24_v33  ;;  %v30_v40 = vpack.c.bf16 %v26_v36, %v26_v36 }
  0x17   :  { %334 = vmatpush.bf16.msra.mxu3 %v574_v20  ;;  %v23_v32 = vld [vmem:[%s765_s0] sm:$0xff] }
  0x18   :  { %296 = vmatpush.bf16.msra.mxu0 %v549_v21  ;;  %v571_v34 = vld [vmem:[%s766_s1 + $0xc0] sm:$0xff]  ;;  %v27_v37 = vpack.c.bf16 %v23_v32, %v23_v32 }
  0x19   :  { %309 = vmatpush.bf16.msra.mxu1 %v557_v22  ;;  %v345_v41 = vld [vmem:[#allocation2] sm:$0x1] }
  0x1a   :  { %322 = vmatpush.bf16.msra.mxu2 %v565_v23  ;;  %348 = vperm.xlu0 %581, %v345_v41   ;;  %v582_v43 = vld [vmem:[%s767_s2] ss:$0 sm:$0xff]  ;;  %s614_s2 = smov [#allocation3]  }
  0x1b   :  { %335 = vmatpush.bf16.msra.mxu3 %v573_v24  ;;  %v344_v55 = vld [vmem:[%s768_s3] sm:$0x1]  ;;  %s405_s3 = sshll.u32 %s614_s2, 4  ;;  %s406_s3 = int_to_ptr.vmem [resolvable:$true] %s405_s3 }
  0x1c   :  { %297 = vmatpush.bf16.msra.mxu0 %v548_v25 }
  0x1d   :  { %310 = vmatpush.bf16.msra.mxu1 %v556_v26 }
  0x1e   :  { %323 = vmatpush.bf16.msra.mxu2 %v564_v27 }
  0x1f   :  { %336 = vmatpush.bf16.msra.mxu3 %v572_v28 }
  0x20   :  { %298 = vmatpush.bf16.msra.mxu0 %v547_v29 }
  0x21   :  { %311 = vmatpush.bf16.msra.mxu1 %v555_v30 }
  0x22   :  { %324 = vmatpush.bf16.msra.mxu2 %v563_v31 }
  0x23   :  { %337 = vmatpush.bf16.msra.mxu3 %v571_v34  ;;  %299 = vmatmul.bf16.vlgmr.msra.gmra.mxu0 %v27_v37 }
  0x24   :  { %312 = vmatmul.bf16.vlgmr.msra.gmra.mxu1 %v28_v38 }
  0x25   :  { %325 = vmatmul.bf16.vlgmr.msra.gmra.mxu2 %v29_v39 }
  0x26   :  { %338 = vmatmul.bf16.vlgmr.msra.gmra.mxu3 %v30_v40 }
  0x8c   :  { %v349_v58 = vpop.permute.xlu0 %348 }
  0x8d   :  { %v351_v59 = vperm.slane %v349_v58, 0 }
  0xa0   :  { %v300_v44 = vpop.f32.mrf.mxu0 }
  0xa1   :  { %v313_v45 = vpop.f32.mrf.mxu1  ;;  %v301_v46 = vadd.f32 %v582_v43, %v300_v44 }
  0xa3   :  { %v314_v47 = vadd.f32 %v313_v45, %v301_v46 }
  0xa8   :  { %v326_v48 = vpop.f32.mrf.mxu2  ;;  %v302_v51 = vpop.f32.mrf.mxu0 }
  0xa9   :  { %v339_v49 = vpop.f32.mrf.mxu3  ;;  %v327_v50 = vadd.f32 %v326_v48, %v314_v47  ;;  %v315_v52 = vpop.f32.mrf.mxu1 }
  0xab   :  { %v340_v53 = vadd.f32 %v339_v49, %v327_v50 }
  0xad   :  { %v343_v54 = vmax.f32 %v340_v53, 0.0 }
  0xaf   :  { %544 = vmatpush.xpose.msk.msrb.mxu0 %vm352_vm0, %v343_v54 }
  0xb0   :  { %v328_v56 = vpop.f32.mrf.mxu2 }
  0xb1   :  { %v341_v57 = vpop.f32.mrf.mxu3 }
  0xb2   :  { %545 = vmatmul.msk.f32.vlgmr.msrb.gmra.mxu0 %vm352_vm0, %v344_v55 }
 0x12f   :  { %v376_v60 = vpop.f32.mrf.mxu0 }
 0x130   :  { %v377_v61 = vadd.f32 %v376_v60, %v351_v59 }
 0x132   :  { %v546_v62 = vmul.f32 -1.442695, %v377_v61 }
 0x134   :  { %583 = vpow2.f32 %v546_v62 }
 0x13a   :  { %v584_v63 = vpop.eup %583 }
 0x13b   :  { %v382_v0 = vadd.f32 1.0, %v584_v63 }
 0x13d   :  { %585 = vrcp.f32 %v382_v0  ;;  %v394_v4 = vand.u32 2147483648, %v382_v0  ;;  %v392_v6 = vand.u32 2147483647, %v382_v0  ;;  %vm388_vm2 = vweird.f32 %v382_v0 }
 0x13f   :  { %v395_v8 = vor.u32 1.1754944e-38, %v394_v4  ;;  %vm393_vm5 = vcmp.eq.f32.partialorder %v392_v6, 8.507059e+37 }
 0x143   :  { %v586_v1 = vpop.eup %585 }
 0x144   :  { %v384_v2 = vmul.f32 %v586_v1, %v382_v0  ;;  %vm389_vm1 = vweird.f32 %v586_v1 }
 0x145   :  { %vm390_vm3 = vmor %vm388_vm2, %vm389_vm1 }
 0x146   :  { %v385_v3 = vsub.f32 1.0, %v384_v2 }
 0x148   :  { %v386_v5 = vmul.f32 %v586_v1, %v385_v3 }
 0x14a   :  { %v387_v7 = vadd.f32 %v586_v1, %v386_v5 }
 0x14c   :  { %v391_v9 = vsel %vm390_vm3, %v586_v1, %v387_v7 }
 0x14d   :  { %v396_v10 = vsel %vm393_vm5, %v395_v8, %v391_v9 }
 0x14e   :  { %399 = vst.msk [vmem:[#allocation3] sm:$0x1] %vm398_vm4, %v396_v10 }
 0x14f   :  { %410 = dma.vmem_to_hbm [thread:$0]  %s406_s3, 16, %s408_s18, [#allocation4]  }
 0x150   :  { %611 = dma.done.wait [#allocation4], 16  }
 0x151   :  { %612 = vsyncadd [#allocation4], 4294967280 }
 0x152   :  { %415 = vsyncpa [#allocation4], 1 }

</bundles_post_ra>
